<compile_context>
chip_gen: v7x
topology: tpu7x:2x2x1
jax: 0.10.0
libtpu: 0.0.40
codegen_flags: <defaults>
</compile_context>

<pallas_src>
import functools

import jax
import jax.numpy as jnp
from jax import lax
from jax.experimental import pallas as pl
from jax.experimental.pallas import tpu as pltpu


def _round_up(x, m):
    return (x + m - 1) // m * m


# ---------------------------------------------------------------------------
# Binary-class (C == 2) lane-dense kernel.
#   pred_ref: (2, T) logits (original dtype), batch mapped to lanes.
#   tgt_ref : (1, T) int8 targets in {0, 1}.
#   w_ref   : (2,)  f32 class weights in SMEM.
#   out_ref : (8, 128) f32 per-step partials: row 0 = sum(w*nll), row 1 = sum(w).
# ---------------------------------------------------------------------------
def _binary_ce_kernel(pred_ref, tgt_ref, w_ref, out_ref, *, n_valid, lane_tile):
    i = pl.program_id(0)

    x = pred_ref[...].astype(jnp.float32)                 # (2, T)
    d = x[0:1, :] - x[1:2, :]                             # (1, T) = x0 - x1
    t1 = tgt_ref[...].astype(jnp.float32)                 # (1, T) in {0, 1}

    # nll = -log_softmax(x)[target] = softplus((x0 - x1) * (2*t - 1)),
    # stable form: max(z, 0) + log(1 + exp(-|z|)).  Mask z *before* the exp so
    # padded / out-of-bounds lanes can never inject NaN into the numerator.
    col = i * lane_tile + lax.broadcasted_iota(jnp.int32, (1, lane_tile), 1)
    valid = col < n_valid
    z = jnp.where(valid, d * (2.0 * t1 - 1.0), 0.0)
    nll = jnp.maximum(z, 0.0) + jnp.log(1.0 + jnp.exp(-jnp.abs(z)))

    w0 = w_ref[0]                                          # scalar reads from SMEM
    w1 = w_ref[1]
    wi = jnp.where(valid, w0 + (w1 - w0) * t1, 0.0)        # per-sample class weight

    # One fused cross-lane reduction yields both partials.
    both = jnp.concatenate([wi * nll, wi], axis=0)         # (2, T)
    part = jnp.sum(both, axis=1, keepdims=True)            # (2, 1)
    blk = jnp.concatenate([part, jnp.zeros((6, 1), jnp.float32)], axis=0)  # (8, 1)
    out_ref[...] = jnp.broadcast_to(blk, (8, 128))


# ---------------------------------------------------------------------------
# General multi-class kernel: (row_tile, C) blocks, full C per block.
#   pred_ref: (R, C) logits (original dtype).
#   tgt_ref : (R, 1) int32 class ids.
#   wi_ref  : (R, 1) f32 pre-gathered per-sample weights (weight[target]).
#   out_ref : (8, 128) f32 per-step partials (row 0 = num, row 1 = den).
# ---------------------------------------------------------------------------
def _general_ce_kernel(pred_ref, tgt_ref, wi_ref, out_ref, *, n_valid, row_tile,
                       num_classes):
    i = pl.program_id(0)
    r, c = row_tile, num_classes

    row_rc = i * row_tile + lax.broadcasted_iota(jnp.int32, (r, c), 0)
    row_r1 = i * row_tile + lax.broadcasted_iota(jnp.int32, (r, 1), 0)

    x = pred_ref[...].astype(jnp.float32)                  # (R, C)
    x = jnp.where(row_rc < n_valid, x, 0.0)                # mask ragged tail before exp
    tgt = tgt_ref[...]                                     # (R, 1) int32

    col = lax.broadcasted_iota(jnp.int32, (r, c), 1)
    m = jnp.max(x, axis=1, keepdims=True)
    lse = jnp.log(jnp.sum(jnp.exp(x - m), axis=1, keepdims=True)) + m
    sel = jnp.sum(jnp.where(col == tgt, x, 0.0), axis=1, keepdims=True)
    nll = lse - sel                                        # (R, 1)

    wi = jnp.where(row_r1 < n_valid, wi_ref[...], 0.0)     # (R, 1)

    num = jnp.sum(wi * nll, axis=0, keepdims=True)         # (1, 1)
    den = jnp.sum(wi, axis=0, keepdims=True)               # (1, 1)
    blk = jnp.concatenate([num, den, jnp.zeros((6, 1), jnp.float32)], axis=0)
    out_ref[...] = jnp.broadcast_to(blk, (8, 128))


def weighted_cross_entropy_loss(pred, target, weight, *, lane_tile=128 * 1024,
                                row_budget_bytes=1024 * 1024):
    """pred: (N, C) logits (any float dtype); target: (N,) int ids; weight: (C,)."""
    n, c = pred.shape
    target = target.astype(jnp.int32)
    weight = jnp.asarray(weight, jnp.float32).reshape(-1)

    # Per-step output blocks are independent -> the grid axis is "parallel"
    # (v7x megacore can shard it; no-op on single-core v5e/v6e).
    compiler_params = pltpu.CompilerParams(dimension_semantics=("parallel",))

    if c == 2:
        # Lane-dense layout: (2, N_pad) with batch on lanes.  One fused
        # pad+transpose relayout in the wrapper (see TODO at top of file).
        t = min(int(lane_tile), _round_up(n, 128))
        n_pad = _round_up(n, t)
        grid = n_pad // t

        tgt_i8 = target.astype(jnp.int8).reshape(1, n)
        if n_pad > n:
            pred_t = jnp.pad(pred.T, ((0, 0), (0, n_pad - n)))
            tgt_row = jnp.pad(tgt_i8, ((0, 0), (0, n_pad - n)))
        else:
            pred_t = pred.T
            tgt_row = tgt_i8

        kernel = functools.partial(_binary_ce_kernel, n_valid=n, lane_tile=t)
        parts = pl.pallas_call(
            kernel,
            out_shape=jax.ShapeDtypeStruct((8, grid * 128), jnp.float32),
            grid=(grid,),
            in_specs=[
                pl.BlockSpec((2, t), lambda i: (0, i)),
                pl.BlockSpec((1, t), lambda i: (0, i)),
                pl.BlockSpec(memory_space=pltpu.SMEM),     # (2,) class weights
            ],
            out_specs=pl.BlockSpec((8, 128), lambda i: (0, i)),
            compiler_params=compiler_params,
        )(pred_t, tgt_row, weight)
    else:
        # Generic path: tile rows, full class dim per block.  Row budget keeps
        # the f32 block (footprint padded to 128 lanes) around 1 MiB so the
        # double-buffered inputs + temporaries fit every generation's scoped
        # VMEM default (16 MiB on v5e, 32 MiB on v6e/v7x).
        itemsize = jnp.dtype(pred.dtype).itemsize
        sub_mult = {4: 8, 2: 16, 1: 32}.get(itemsize, 8)   # native sublane multiple
        c_pad = _round_up(c, 128)
        rows_fit = max(sub_mult, row_budget_bytes // (c_pad * 4))
        row_tile = max(sub_mult, (min(2048, rows_fit) // sub_mult) * sub_mult)

        wi_full = weight[target].reshape(n, 1)             # pre-gathered weights
        tgt_col = target.reshape(n, 1)

        if n <= row_tile:
            # Single block: pad the (small) arrays so the block covers them exactly.
            row_tile = _round_up(n, sub_mult)
            pad = row_tile - n
            if pad:
                pred_in = jnp.pad(pred, ((0, pad), (0, 0)))
                tgt_in = jnp.pad(tgt_col, ((0, pad), (0, 0)))
                wi_in = jnp.pad(wi_full, ((0, pad), (0, 0)))
            else:
                pred_in, tgt_in, wi_in = pred, tgt_col, wi_full
        else:
            # No padding copy for large N: the ragged last block is masked in-kernel.
            pred_in, tgt_in, wi_in = pred, tgt_col, wi_full

        grid = pl.cdiv(pred_in.shape[0], row_tile)
        kernel = functools.partial(_general_ce_kernel, n_valid=n,
                                   row_tile=row_tile, num_classes=c)
        parts = pl.pallas_call(
            kernel,
            out_shape=jax.ShapeDtypeStruct((8, grid * 128), jnp.float32),
            grid=(grid,),
            in_specs=[
                pl.BlockSpec((row_tile, c), lambda i: (i, 0)),
                pl.BlockSpec((row_tile, 1), lambda i: (i, 0)),
                pl.BlockSpec((row_tile, 1), lambda i: (i, 0)),
            ],
            out_specs=pl.BlockSpec((8, 128), lambda i: (0, i)),
            compiler_params=compiler_params,
        )(pred_in, tgt_in, wi_in)

    parts = parts.reshape(8, -1, 128)
    num = jnp.sum(parts[0, :, 0])
    den = jnp.sum(parts[1, :, 0])
    return {"loss": num / den}


class CrossEntropyLossRawNet:
    """JAX/Pallas equivalent of CrossEntropyLoss_RawNet."""

    def __init__(self, weight):
        self.weight = jnp.asarray(weight, dtype=jnp.float32)

    def __call__(self, pred, target, **kwargs):
        return weighted_cross_entropy_loss(pred, target, self.weight)


def _reference_loss(pred, target, weight):
    # Pure-JAX reference for sanity check.
    logp = jax.nn.log_softmax(pred.astype(jnp.float32), axis=-1)
    nll = -jnp.take_along_axis(logp, target[:, None].astype(jnp.int32), axis=-1)[:, 0]
    wi = weight[target]
    return jnp.sum(wi * nll) / jnp.sum(wi)


if __name__ == "__main__":
    key = jax.random.PRNGKey(0)
    k1, k2, k3, k4, k5, k6, k7, k8 = jax.random.split(key, 8)

    # Primary RawNet2 configuration: binary anti-spoofing, small batch.
    class_weight = [0.1, 0.9]
    loss_fn = CrossEntropyLossRawNet(class_weight)

    n, c = 8, 2
    pred = jax.random.normal(k1, (n, c), dtype=jnp.float32)
    target = jax.random.randint(k2, (n,), 0, c, dtype=jnp.int32)
    out = loss_fn(pred, target)
    loss = jax.block_until_ready(out["loss"])
    ref = _reference_loss(pred, target, jnp.asarray(class_weight, jnp.float32))
    assert jnp.allclose(loss, ref, atol=1e-5, rtol=1e-5), (loss, ref)

    # Larger binary batch in bf16: exercises the multi-step lane-dense grid,
    # tail masking, int8 targets, and the in-kernel (not wrapper) f32 cast.
    n2 = 300
    pred2 = jax.random.normal(k3, (n2, c), dtype=jnp.bfloat16)
    target2 = jax.random.randint(k4, (n2,), 0, c, dtype=jnp.int32)
    out2 = weighted_cross_entropy_loss(
        pred2, target2, jnp.asarray(class_weight, jnp.float32), lane_tile=128)
    loss2 = jax.block_until_ready(out2["loss"])
    ref2 = _reference_loss(pred2, target2, jnp.asarray(class_weight, jnp.float32))
    assert jnp.allclose(loss2, ref2, atol=1e-4, rtol=1e-4), (loss2, ref2)

    # Multi-class path (C != 2), single block.
    n3, c3 = 16, 4
    pred3 = jax.random.normal(k5, (n3, c3), dtype=jnp.float32)
    target3 = jax.random.randint(k6, (n3,), 0, c3, dtype=jnp.int32)
    w3 = jnp.asarray([0.4, 0.3, 0.2, 0.1], jnp.float32)
    out3 = weighted_cross_entropy_loss(pred3, target3, w3)
    loss3 = jax.block_until_ready(out3["loss"])
    ref3 = _reference_loss(pred3, target3, w3)
    assert jnp.allclose(loss3, ref3, atol=1e-5, rtol=1e-5), (loss3, ref3)

    # Multi-class path, multi-block with a ragged (unpadded) last block.
    n4, c4 = 300, 5
    pred4 = jax.random.normal(k7, (n4, c4), dtype=jnp.float32)
    target4 = jax.random.randint(k8, (n4,), 0, c4, dtype=jnp.int32)
    w4 = jnp.asarray([0.3, 0.25, 0.2, 0.15, 0.1], jnp.float32)
    out4 = weighted_cross_entropy_loss(pred4, target4, w4,
                                       row_budget_bytes=16 * 1024)
    loss4 = jax.block_until_ready(out4["loss"])
    ref4 = _reference_loss(pred4, target4, w4)
    assert jnp.allclose(loss4, ref4, atol=1e-5, rtol=1e-5), (loss4, ref4)

    print("KERNEL_OK")
</pallas_src>

<mosaic_0001>
module attributes {stable_mosaic.version = 11 : i64} {
  func.func @_binary_ce_kernel(%arg0: i32, %arg1: memref<2x128xf32, #tpu.memory_space<vmem>>, %arg2: memref<1x128xi8, #tpu.memory_space<vmem>>, %arg3: memref<2xf32, #tpu.memory_space<smem>>, %arg4: memref<8x128xf32, #tpu.memory_space<vmem>>) attributes {dimension_semantics = [#tpu.dimension_semantics<parallel>], iteration_bounds = array<i64: 1>, scalar_prefetch = 0 : i64, scratch_operands = 0 : i64, tpu.core_type = #tpu.core_type<tc>, window_params = [{transform_indices = @transform_0, window_bounds = array<i64: 2, 128>}, {transform_indices = @transform_1, window_bounds = array<i64: 1, 128>}, {transform_indices = @transform_2, window_bounds = array<i64: 2>}, {transform_indices = @transform_3, window_bounds = array<i64: 8, 128>}]} {
    %c0 = arith.constant 0 : index
    %c0_0 = arith.constant 0 : index
    %0 = vector.load %arg1[%c0, %c0_0] : memref<2x128xf32, #tpu.memory_space<vmem>>, vector<2x128xf32>
    %1 = vector.extract_strided_slice %0 {offsets = [0, 0], sizes = [1, 128], strides = [1, 1]} : vector<2x128xf32> to vector<1x128xf32>
    %2 = vector.extract_strided_slice %0 {offsets = [1, 0], sizes = [1, 128], strides = [1, 1]} : vector<2x128xf32> to vector<1x128xf32>
    %3 = arith.subf %1, %2 : vector<1x128xf32>
    %c0_1 = arith.constant 0 : index
    %c0_2 = arith.constant 0 : index
    %4 = vector.load %arg2[%c0_1, %c0_2] : memref<1x128xi8, #tpu.memory_space<vmem>>, vector<1x128xi8>
    %5 = arith.sitofp %4 : vector<1x128xi8> to vector<1x128xf32>
    %c128_i32 = arith.constant 128 : i32
    %6 = arith.muli %arg0, %c128_i32 : i32
    %7 = tpu.iota {dimensions = array<i32: 1>} : vector<1x128xi32>
    %8 = vector.broadcast %6 : i32 to vector<1x128xi32>
    %9 = arith.addi %8, %7 : vector<1x128xi32>
    %c8_i32 = arith.constant 8 : i32
    %10 = vector.broadcast %c8_i32 : i32 to vector<1x128xi32>
    %11 = arith.cmpi slt, %9, %10 : vector<1x128xi32>
    %cst = arith.constant 2.000000e+00 : f32
    %12 = vector.broadcast %cst : f32 to vector<1x128xf32>
    %13 = arith.mulf %12, %5 : vector<1x128xf32>
    %cst_3 = arith.constant 1.000000e+00 : f32
    %14 = vector.broadcast %cst_3 : f32 to vector<1x128xf32>
    %15 = arith.subf %13, %14 : vector<1x128xf32>
    %16 = arith.mulf %3, %15 : vector<1x128xf32>
    %cst_4 = arith.constant 0.000000e+00 : f32
    %17 = vector.broadcast %cst_4 : f32 to vector<1x128xf32>
    %18 = arith.select %11, %16, %17 : vector<1x128xi1>, vector<1x128xf32>
    %cst_5 = arith.constant 0.000000e+00 : f32
    %19 = vector.broadcast %cst_5 : f32 to vector<1x128xf32>
    %20 = arith.maximumf %18, %19 : vector<1x128xf32>
    %21 = math.absf %18 : vector<1x128xf32>
    %cst_6 = arith.constant 0.000000e+00 : f32
    %22 = vector.broadcast %cst_6 : f32 to vector<1x128xf32>
    %23 = arith.subf %22, %21 : vector<1x128xf32>
    %24 = math.exp %23 : vector<1x128xf32>
    %cst_7 = arith.constant 1.000000e+00 : f32
    %25 = vector.broadcast %cst_7 : f32 to vector<1x128xf32>
    %26 = arith.addf %25, %24 : vector<1x128xf32>
    %27 = math.log %26 : vector<1x128xf32>
    %28 = arith.addf %20, %27 : vector<1x128xf32>
    %c0_8 = arith.constant 0 : index
    %29 = memref.load %arg3[%c0_8] : memref<2xf32, #tpu.memory_space<smem>>
    %c1 = arith.constant 1 : index
    %30 = memref.load %arg3[%c1] : memref<2xf32, #tpu.memory_space<smem>>
    %31 = arith.subf %30, %29 : f32
    %32 = vector.broadcast %31 : f32 to vector<1x128xf32>
    %33 = arith.mulf %32, %5 : vector<1x128xf32>
    %34 = vector.broadcast %29 : f32 to vector<1x128xf32>
    %35 = arith.addf %34, %33 : vector<1x128xf32>
    %cst_9 = arith.constant 0.000000e+00 : f32
    %36 = vector.broadcast %cst_9 : f32 to vector<1x128xf32>
    %37 = arith.select %11, %35, %36 : vector<1x128xi1>, vector<1x128xf32>
    %38 = arith.mulf %37, %28 : vector<1x128xf32>
    %39 = tpu.concatenate %38, %37 in 0 : vector<1x128xf32>, vector<1x128xf32> -> vector<2x128xf32>
    %cst_10 = arith.constant dense<0.000000e+00> : vector<2xf32>
    %40 = vector.multi_reduction <add>, %39, %cst_10 [1] : vector<2x128xf32> to vector<2xf32>
    %41 = vector.shape_cast %40 : vector<2xf32> to vector<2x1xf32>
    %cst_11 = arith.constant 0.000000e+00 : f32
    %42 = vector.broadcast %cst_11 : f32 to vector<6x1xf32>
    %43 = tpu.concatenate %41, %42 in 0 : vector<2x1xf32>, vector<6x1xf32> -> vector<8x1xf32>
    %44 = vector.shape_cast %43 : vector<8x1xf32> to vector<8x1xf32>
    %45 = vector.broadcast %44 : vector<8x1xf32> to vector<8x128xf32>
    %c0_12 = arith.constant 0 : index
    %c0_13 = arith.constant 0 : index
    %46 = vector.load %arg4[%c0_12, %c0_13] : memref<8x128xf32, #tpu.memory_space<vmem>>, vector<8x128xf32>
    tpu.vector_store %arg4[%c0_12, %c0_13], %45 {strides = array<i32>} : memref<8x128xf32, #tpu.memory_space<vmem>>, vector<8x128xf32>,
    return
  }
  func.func @transform_0(%arg0: i32) -> (i32, i32) {
    %c0_i32 = arith.constant 0 : i32
    %c0_i32_0 = arith.constant 0 : i32
    return %c0_i32, %arg0 : i32, i32
  }
  func.func @transform_1(%arg0: i32) -> (i32, i32) {
    %c0_i32 = arith.constant 0 : i32
    %c0_i32_0 = arith.constant 0 : i32
    return %c0_i32, %arg0 : i32, i32
  }
  func.func @transform_2(%arg0: i32) -> i32 {
    %c0_i32 = arith.constant 0 : i32
    %c0_i32_0 = arith.constant 0 : i32
    return %c0_i32 : i32
  }
  func.func @transform_3(%arg0: i32) -> (i32, i32) {
    %c0_i32 = arith.constant 0 : i32
    %c0_i32_0 = arith.constant 0 : i32
    return %c0_i32, %arg0 : i32, i32
  }
}

</mosaic_0001>

<bundles_post_ra>
// kernel: tpu_custom_call.1
= control target key start
LH: loop header
LB: loop body
LE: loop exit
PB: predicated region body
PF: predicated region fallthrough
CT: control target
= control target key end

     0   :  { %8 = vsyncpa [#allocation3], 0  ;;  %s237_s0 = inlined_call_operand.hbm [shape: f32[2,128], index: 0, kind: input, shape index: {}]   ;;  %s238_s1 = inlined_call_operand.vmem [shape: s8[1,128], index: 1, kind: input, shape index: {}]   ;;  %s239_s2 = inlined_call_operand.vmem [shape: f32[2], index: 2, kind: input, shape index: {}]   ;;  %s240_s3 = inlined_call_operand.hbm [shape: f32[8,128], index: 3, kind: output, shape index: {}]  }
   0x1   :  { %9 = vsyncpa [#allocation5], 0 }
   0x2   :  { %10 = vsyncpa [#allocation4], 0  ;;  %s29_s14 = sshll.u32 %s239_s2, 4  ;;  %s181_s15 = smov [#allocation2]   ;;  %s30_s14 = int_to_ptr.vmem [resolvable:$true] %s29_s14 }
   0x3   :  { %s17_s16 = sshll.u32 %s181_s15, 4  ;;  %s119_s19 = scalar_lea.hbm %s237_s0, 32  ;;  %s18_s16 = int_to_ptr.vmem [resolvable:$true] %s17_s16 }
   0x4   :  { %p120_p0 = scmp.ne.s32.totalorder %s237_s0, %s119_s19  ;;  %p123_p1 = scmp.lt.u32.totalorder %s119_s19, %s237_s0 }
   0x6   :  { %p125_p2 = pnand %p123_p1, %p120_p0 }
   0x8   :  { %128 = shalt.err (!%p125_p2)
}
   0x9   :  { %s129_s24 = scalar_lea.vmem %s18_s16, 32  ;;  %p134_p4 = scmp.lt.s32.totalorder %s18_s16, %s18_s16 }
   0xa   :  { %p130_p3 = scmp.ne.s32.totalorder %s18_s16, %s129_s24  ;;  %p135_p5 = scmp.lt.s32.totalorder %s129_s24, %s129_s24 }
   0xc   :  { %p136_p6 = por %p135_p5, %p134_p4 }
   0xe   :  { %p137_p7 = pnand %p136_p6, %p130_p3 }
  0x10   :  { %140 = shalt.err (!%p137_p7)
}
  0x11   :  { %20 = dma.hbm_to_vmem [thread:$0]  %s237_s0, 32, %s18_s16, [#allocation3]  }
  0x12   :  { %s141_s26 = scalar_lea.vmem %s30_s14, 16  ;;  %p146_p9 = scmp.lt.s32.totalorder %s30_s14, %s30_s14 }
  0x13   :  { %p142_p8 = scmp.ne.s32.totalorder %s30_s14, %s141_s26  ;;  %p147_p10 = scmp.lt.s32.totalorder %s141_s26, %s141_s26 }
  0x15   :  { %p148_p11 = por %p147_p10, %p146_p9 }
  0x17   :  { %p149_p12 = pnand %p148_p11, %p142_p8 }
  0x19   :  { %152 = shalt.err (!%p149_p12)
}
  0x1a   :  { %s182_s27 = smov [#allocation6]  }
  0x1b   :  { %32 = dma.vmem_to_smem %s30_s14, 16, %s182_s27, [#allocation5]  }
  0x1c   :  { %175 = dma.done.wait [#allocation3], 32  }
  0x1d   :  { %176 = vsyncadd [#allocation3], 4294967264 }
  0x1e   :  { %177 = dma.done.wait [#allocation5], 16  }
  0x1f   :  { %178 = vsyncadd [#allocation5], 4294967280 }
  0x20   :  { %39 = sfence }
  0x21   :  { %v40_v0 = vld [vmem:[#allocation2] sm:$0x3]  ;;  %v49_v2 = vlaneseq  ;;  %s67_s0 = sld [smem:[#allocation6]]  ;;  %s109_s30 = sld [smem:[#allocation6 + $0x1]]  ;;  %vm79_vm1 = vcmask 1040384   ;;  %vm81_vm2 = vcmask 1041408  }
  0x22   :  { %v45_v1 = vld [vmem:[%s238_s1] sm:$0x1]  ;;  %v42_v3 = vrot.slane %v40_v0, 1  ;;  %v183_v30 = vmov 0   ;;  %s184_s1 = smov [#allocation7]  }
  0x23   :  { %v46_v4 = vunpack.c.0.s8 %v45_v1  ;;  %v50_v6 = vand.u32 127, %v49_v2  ;;  %114 = vset.pattern.permute.xlu0 %v183_v30  ;;  %s98_s5 = sshll.u32 %s184_s1, 4  ;;  %s99_s5 = int_to_ptr.vmem [resolvable:$true] %s98_s5 }
  0x24   :  { %v44_v7 = vsub.f32 %v40_v0, %v42_v3  ;;  %s153_s6 = scalar_lea.vmem %s99_s5, 128  ;;  %p158_p0 = scmp.lt.s32.totalorder %s99_s5, %s99_s5 }
  0x25   :  { %v47_v5 = vcvt.s32.f32 %v46_v4  ;;  %vm53_vm0 = vcmp.lt.s32.totalorder %v50_v6, 8  ;;  %p154_p13 = scmp.ne.s32.totalorder %s99_s5, %s153_s6  ;;  %p159_p1 = scmp.lt.s32.totalorder %s153_s6, %s153_s6 }
  0x27   :  { %v54_v8 = vmul.f32 2.0, %v47_v5  ;;  %s69_s4 = ssub.f32 %s109_s30, %s67_s0  ;;  %v72_v19 = vstv %s67_s0  ;;  %p160_p2 = por %p159_p1, %p158_p0 }
  0x29   :  { %v108_v9 = vadd.f32 -1.0, %v54_v8  ;;  %v70_v17 = vstv %s69_s4  ;;  %p161_p3 = pnand %p160_p2, %p154_p13 }
  0x2a   :  { %v71_v18 = vmul.f32 %v70_v17, %v47_v5 }
  0x2b   :  { %v56_v10 = vmul.f32 %v108_v9, %v44_v7 }
  0x2c   :  { %v73_v20 = vadd.f32 %v72_v19, %v71_v18 }
  0x2d   :  { %v57_v11 = vsel %vm53_vm0, %v56_v10, 0.0 }
  0x2e   :  { %v59_v12 = vand.u32 2147483647, %v57_v11  ;;  %v58_v21 = vmax.f32 %v57_v11, 0.0  ;;  %v74_v23 = vsel %vm53_vm0, %v73_v20, 0.0 }
  0x2f   :  { %v77_v26 = vrot.slane %v74_v23, 7 }
  0x30   :  { %v60_v13 = vsub.f32 0.0, %v59_v12 }
  0x32   :  { %v61_v14 = vmul.f32 1.442695, %v60_v13 }
  0x34   :  { %115 = vpow2.f32 %v61_v14 }
  0x3e   :  { %v116_v15 = vpop.eup %115 }
  0x3f   :  { %v63_v16 = vadd.f32 1.0, %v116_v15 }
  0x41   :  { %117 = vlog2.f32 %v63_v16 }
  0x4b   :  { %v118_v22 = vpop.eup %117 }
  0x4c   :  { %v65_v24 = vmul.f32 0.6931472, %v118_v22 }
  0x4e   :  { %v66_v25 = vadd.f32 %v65_v24, %v58_v21 }
  0x50   :  { %v75_v27 = vmul.f32 %v74_v23, %v66_v25 }
  0x52   :  { %v80_v28 = vsel %vm79_vm1, %v75_v27, %v77_v26 }
  0x53   :  { %v82_v29 = vsel %vm81_vm2, %v80_v28, 0.0 }
  0x54   :  { %83 = vadd.xlane.f32.xlu0 %v82_v29 }
  0xe1   :  { %v84_v31 = vpop.xlane.xlu0 %83 }
  0xe2   :  { %v85_v32 = vsel %vm81_vm2, %v84_v31, 0.0 }
  0xe3   :  { %88 = vperm.xlu0 %114, %v85_v32  }
 0x162   :  { %v89_v33 = vpop.permute.xlu0 %88 }
 0x163   :  { %91 = vst [vmem:[#allocation7] sm:$0xff] %v89_v33 }
 0x164   :  { %164 = shalt.err (!%p161_p3)
}
 0x165   :  { %s165_s9 = scalar_lea.hbm %s240_s3, 128 }
 0x166   :  { %p166_p4 = scmp.ne.s32.totalorder %s240_s3, %s165_s9  ;;  %p169_p5 = scmp.lt.u32.totalorder %s165_s9, %s240_s3 }
 0x168   :  { %p171_p6 = pnand %p169_p5, %p166_p4 }
 0x16a   :  { %174 = shalt.err (!%p171_p6)
}
 0x16b   :  { %101 = dma.vmem_to_hbm [thread:$0]  %s99_s5, 128, %s240_s3, [#allocation4]  }
 0x16c   :  { %179 = dma.done.wait [#allocation4], 128  }
 0x16d   :  { %180 = vsyncadd [#allocation4], 4294967168 }
 0x16e   :  { %105 = vsyncpa [#allocation3], 1 }
 0x16f   :  { %106 = vsyncpa [#allocation4], 1 }
 0x170   :  { %107 = vsyncpa [#allocation5], 1 }

</bundles_post_ra>
